<compile_context>
chip_gen: v6e
topology: v6e:2x2x1
jax: 0.10.0
libtpu: 0.0.40
codegen_flags: <defaults>
</compile_context>

<pallas_src>
import functools

import jax
import jax.numpy as jnp
from jax.experimental import pallas as pl
from jax.experimental.pallas import tpu as pltpu


# ---------------------------------------------------------------------------
# helpers
# ---------------------------------------------------------------------------
def _vmem_capacity_bytes():
    try:
        return int(pltpu.get_tpu_info().vmem_capacity_bytes)
    except Exception:
        return 64 * 1024 * 1024  # conservative fallback: v7x per-TensorCore VMEM


def _round_up(x, m):
    return (x + m - 1) // m * m


def _choose_fused_tb(B, sample_bytes, block_budget):
    """Batch tile for the fused path (multiple of 8, or ==B), or None -> two-pass."""
    if sample_bytes > block_budget:
        return None
    per = max(sample_bytes, 1)
    if B <= 8:
        # tb == B is always sublane-legal; tiny total data, a single step is fine.
        return B if B * per <= block_budget else None
    tb_max = (min(B, block_budget // per) // 8) * 8
    if tb_max < 8:
        return None
    # Target >= 4 grid steps (>= 2 per TensorCore on v7x, pipelining everywhere).
    target = _round_up(-(-B // 4), 8)
    return max(8, min(tb_max, target))


# ---------------------------------------------------------------------------
# fused kernel: one (tb, N) slab per step -> read-once / write-once
# ---------------------------------------------------------------------------
def _ln_fused_kernel(x_ref, g_ref, b_ref, o_ref, *, eps, n):
    x = x_ref[...].astype(jnp.float32)                    # cast in-register, HBM stays narrow
    mean = jnp.sum(x, axis=1, keepdims=True) * (1.0 / n)  # (tb, 1)
    d = x - mean                                           # second pass is VMEM-only
    ss = jnp.sum(d * d, axis=1, keepdims=True)             # (tb, 1)
    std = jnp.sqrt(ss * (1.0 / (n - 1.0)))                 # unbiased std (torch.std); n==1 -> NaN like torch
    inv = 1.0 / (std + eps)                                 # eps added to std (module semantics)
    o_ref[...] = ((d * inv) * g_ref[...] + b_ref[...]).astype(o_ref.dtype)


# ---------------------------------------------------------------------------
# two-pass path for samples larger than the block budget
# pass 1: per-sample sum / sum-of-squares accumulated over H*W tiles
# ---------------------------------------------------------------------------
def _ln_stats_kernel(x_ref, mean_ref, inv_ref, s_acc, ss_acc, *, eps, n, n_elems, t_n):
    j = pl.program_id(1)

    @pl.when(j == 0)
    def _():
        s_acc[...] = jnp.zeros_like(s_acc)
        ss_acc[...] = jnp.zeros_like(ss_acc)

    x = x_ref[...].astype(jnp.float32)                     # (tb, t_n)
    col = jax.lax.broadcasted_iota(jnp.int32, x.shape, 1) + j * t_n
    x = jnp.where(col < n_elems, x, 0.0)                   # mask ragged lane tail
    s_acc[...] += jnp.sum(x, axis=1, keepdims=True)
    ss_acc[...] += jnp.sum(x * x, axis=1, keepdims=True)

    @pl.when(j == pl.num_programs(1) - 1)
    def _():
        s = s_acc[...]
        mean = s * (1.0 / n)
        var = (ss_acc[...] - s * mean) * (1.0 / (n - 1.0))  # unbiased
        std = jnp.sqrt(jnp.maximum(var, 0.0))
        mean_ref[...] = mean
        inv_ref[...] = 1.0 / (std + eps)


# pass 2: normalize + affine, fully tiled / fully parallel
def _ln_apply_kernel(x_ref, mean_ref, inv_ref, g_ref, b_ref, o_ref):
    x = x_ref[...].astype(jnp.float32)
    xn = (x - mean_ref[...]) * inv_ref[...]
    o_ref[...] = (xn * g_ref[...] + b_ref[...]).astype(o_ref.dtype)


# ---------------------------------------------------------------------------
# wrapper: NC... input (PyTorch layout), per-channel gamma/beta of length C.
# For affine=False pass gamma=None, beta=None.
# ---------------------------------------------------------------------------
def layer_norm(x, gamma=None, beta=None, *, eps=1e-5, max_block_bytes=None):
    orig_shape = x.shape
    orig_dtype = x.dtype
    B = x.shape[0]
    C = x.shape[1] if x.ndim >= 2 else 1
    hw = 1
    for d in x.shape[2:]:
        hw *= d
    N = C * hw
    itemsize = jnp.dtype(orig_dtype).itemsize

    # Lane-dense 2D layout: the whole per-sample reduction axis sits on lanes,
    # batch sits on sublanes. No dtype cast here — casts happen in-kernel.
    x2 = x.reshape(B, N)

    # gamma/beta expanded once to per-element vectors (one sample's worth; tiny).
    if gamma is None:
        g2 = jnp.ones((1, N), jnp.float32)
    else:
        g2 = jnp.broadcast_to(gamma.astype(jnp.float32).reshape(C, 1), (C, hw)).reshape(1, N)
    if beta is None:
        b2 = jnp.zeros((1, N), jnp.float32)
    else:
        b2 = jnp.broadcast_to(beta.astype(jnp.float32).reshape(C, 1), (C, hw)).reshape(1, N)

    # Generation-aware VMEM budget + explicit scoped limit.
    vmem_cap = _vmem_capacity_bytes()
    block_budget = max(512 * 1024, min(4 * 1024 * 1024, vmem_cap // 32))
    if max_block_bytes is not None:
        block_budget = int(max_block_bytes)
    vmem_limit = int(min(vmem_cap * 3 // 4, 96 * 1024 * 1024))

    sample_bytes = N * itemsize
    nf = float(N)
    tb = _choose_fused_tb(B, sample_bytes, block_budget)

    if tb is not None:
        # ----- fused path: one HBM read + one HBM write of the activation -----
        grid_b = pl.cdiv(B, tb)
        out2 = pl.pallas_call(
            functools.partial(_ln_fused_kernel, eps=float(eps), n=nf),
            out_shape=jax.ShapeDtypeStruct((B, N), orig_dtype),
            grid=(grid_b,),
            in_specs=[
                pl.BlockSpec((tb, N), lambda i: (i, 0)),   # activation slab (ragged last block OK)
                pl.BlockSpec((1, N), lambda i: (0, 0)),    # gamma (resident)
                pl.BlockSpec((1, N), lambda i: (0, 0)),    # beta  (resident)
            ],
            out_specs=pl.BlockSpec((tb, N), lambda i: (i, 0)),
            compiler_params=pltpu.CompilerParams(
                dimension_semantics=("parallel",),
                vmem_limit_bytes=vmem_limit,
            ),
        )(x2, g2, b2)
    else:
        # ----- two-pass path: sample exceeds the block budget, tile H*W -----
        tb1 = min(8, B)
        tile_budget = max(4096, min(block_budget, 2 * 1024 * 1024))
        t_n = (tile_budget // (tb1 * itemsize)) // 128 * 128
        t_n = max(128, min(t_n, _round_up(N, 128)))
        grid_b = pl.cdiv(B, tb1)
        grid_j = pl.cdiv(N, t_n)

        mean, inv = pl.pallas_call(
            functools.partial(_ln_stats_kernel, eps=float(eps), n=nf, n_elems=N, t_n=t_n),
            out_shape=(
                jax.ShapeDtypeStruct((B, 1), jnp.float32),
                jax.ShapeDtypeStruct((B, 1), jnp.float32),
            ),
            grid=(grid_b, grid_j),
            in_specs=[pl.BlockSpec((tb1, t_n), lambda i, j: (i, j))],
            out_specs=(
                pl.BlockSpec((tb1, 1), lambda i, j: (i, 0)),
                pl.BlockSpec((tb1, 1), lambda i, j: (i, 0)),
            ),
            scratch_shapes=[
                pltpu.VMEM((tb1, 1), jnp.float32),   # running sum
                pltpu.VMEM((tb1, 1), jnp.float32),   # running sum of squares
            ],
            compiler_params=pltpu.CompilerParams(
                dimension_semantics=("parallel", "arbitrary"),
                vmem_limit_bytes=vmem_limit,
            ),
        )(x2)

        out2 = pl.pallas_call(
            _ln_apply_kernel,
            out_shape=jax.ShapeDtypeStruct((B, N), orig_dtype),
            grid=(grid_b, grid_j),
            in_specs=[
                pl.BlockSpec((tb1, t_n), lambda i, j: (i, j)),
                pl.BlockSpec((tb1, 1), lambda i, j: (i, 0)),
                pl.BlockSpec((tb1, 1), lambda i, j: (i, 0)),
                pl.BlockSpec((1, t_n), lambda i, j: (0, j)),
                pl.BlockSpec((1, t_n), lambda i, j: (0, j)),
            ],
            out_specs=pl.BlockSpec((tb1, t_n), lambda i, j: (i, j)),
            compiler_params=pltpu.CompilerParams(
                dimension_semantics=("parallel", "parallel"),
                vmem_limit_bytes=vmem_limit,
            ),
        )(x2, mean, inv, g2, b2)

    return out2.reshape(orig_shape)


# ---------------------------------------------------------------------------
# Pure-JAX reference implementing the exact PyTorch module semantics.
# ---------------------------------------------------------------------------
def layer_norm_ref(x, gamma, beta, eps):
    Bn = x.shape[0]
    xf = x.reshape(Bn, -1)
    nelem = xf.shape[1]
    mean = xf.mean(axis=1)
    var = jnp.sum((xf - mean[:, None]) ** 2, axis=1) / (nelem - 1)   # unbiased
    std = jnp.sqrt(var)
    shp = (Bn,) + (1,) * (x.ndim - 1)
    xn = (x - mean.reshape(shp)) / (std.reshape(shp) + eps)
    gshp = (1, -1) + (1,) * (x.ndim - 2)
    return xn * gamma.reshape(gshp) + beta.reshape(gshp)


if __name__ == "__main__":
    key = jax.random.PRNGKey(0)
    kx, kg, kb, kx2, kx3 = jax.random.split(key, 5)
    eps = 1e-5

    # --- canonical small shape: batch=2, channels=4, 16x16 spatial (fused path)
    B, C, H, W = 2, 4, 16, 16
    x = jax.random.normal(kx, (B, C, H, W), dtype=jnp.float32)
    gamma = jax.random.uniform(kg, (C,), dtype=jnp.float32)   # matches Tensor(C).uniform_()
    beta = 0.1 * jax.random.normal(kb, (C,), dtype=jnp.float32)

    fn = jax.jit(functools.partial(layer_norm, eps=eps))
    out = jax.block_until_ready(fn(x, gamma, beta))
    exp = layer_norm_ref(x, gamma, beta, eps)
    assert out.shape == x.shape and out.dtype == x.dtype
    assert jnp.allclose(out, exp, atol=1e-5, rtol=1e-5), float(jnp.abs(out - exp).max())

    # --- x.size(0) == 1 branch (whole-tensor stats == per-sample stats for B==1)
    out1 = jax.block_until_ready(fn(x[:1], gamma, beta))
    exp1 = layer_norm_ref(x[:1], gamma, beta, eps)
    assert jnp.allclose(out1, exp1, atol=1e-5, rtol=1e-5), float(jnp.abs(out1 - exp1).max())

    # --- bf16 input: stays bf16 through HBM, stats accumulated in f32 in-kernel
    xb = jax.random.normal(kx2, (B, C, H, W), dtype=jnp.float32).astype(jnp.bfloat16)
    outb = jax.block_until_ready(fn(xb, gamma, beta))
    expb = layer_norm_ref(xb.astype(jnp.float32), gamma, beta, eps)
    assert outb.dtype == jnp.bfloat16
    assert jnp.allclose(outb.astype(jnp.float32), expb, atol=5e-2, rtol=5e-2)

    # --- ragged batch on the fused path (B=10 -> tb=8, masked last block), N=324
    B2, H2 = 10, 9
    xr = jax.random.normal(kx3, (B2, C, H2, H2), dtype=jnp.float32)
    outr = jax.block_until_ready(fn(xr, gamma, beta))
    expr = layer_norm_ref(xr, gamma, beta, eps)
    assert jnp.allclose(outr, expr, atol=1e-5, rtol=1e-5), float(jnp.abs(outr - expr).max())

    # --- two-pass path (force a tiny block budget so the sample "doesn't fit"),
    #     exercises H*W tiling, accumulators, masked ragged lane/batch tiles
    fn_big = jax.jit(functools.partial(layer_norm, eps=eps, max_block_bytes=512))
    outt = jax.block_until_ready(fn_big(xr, gamma, beta))
    assert jnp.allclose(outt, expr, atol=1e-4, rtol=1e-4), float(jnp.abs(outt - expr).max())

    print("KERNEL_OK")
</pallas_src>

<mosaic_0001>
module attributes {stable_mosaic.version = 11 : i64} {
  func.func @_ln_fused_kernel(%arg0: i32, %arg1: memref<2x1024xf32, #tpu.memory_space<vmem>>, %arg2: memref<1x1024xf32, #tpu.memory_space<vmem>>, %arg3: memref<1x1024xf32, #tpu.memory_space<vmem>>, %arg4: memref<2x1024xf32, #tpu.memory_space<vmem>>) attributes {dimension_semantics = [#tpu.dimension_semantics<parallel>], iteration_bounds = array<i64: 1>, scalar_prefetch = 0 : i64, scratch_operands = 0 : i64, tpu.core_type = #tpu.core_type<tc>, window_params = [{transform_indices = @transform_0, window_bounds = array<i64: 2, 1024>}, {pipeline_mode = #tpu.pipeline_mode<synchronous>, transform_indices = @transform_1, window_bounds = array<i64: 1, 1024>}, {pipeline_mode = #tpu.pipeline_mode<synchronous>, transform_indices = @transform_2, window_bounds = array<i64: 1, 1024>}, {transform_indices = @transform_3, window_bounds = array<i64: 2, 1024>}]} {
    %c0 = arith.constant 0 : index
    %c0_0 = arith.constant 0 : index
    %0 = vector.load %arg1[%c0, %c0_0] : memref<2x1024xf32, #tpu.memory_space<vmem>>, vector<2x1024xf32>
    %cst = arith.constant dense<0.000000e+00> : vector<2xf32>
    %1 = vector.multi_reduction <add>, %0, %cst [1] : vector<2x1024xf32> to vector<2xf32>
    %2 = vector.shape_cast %1 : vector<2xf32> to vector<2x1xf32>
    %cst_1 = arith.constant 9.765625E-4 : f32
    %3 = vector.broadcast %cst_1 : f32 to vector<2x1xf32>
    %4 = arith.mulf %2, %3 : vector<2x1xf32>
    %5 = vector.broadcast %4 : vector<2x1xf32> to vector<2x1024xf32>
    %6 = arith.subf %0, %5 : vector<2x1024xf32>
    %7 = arith.mulf %6, %6 : vector<2x1024xf32>
    %cst_2 = arith.constant dense<0.000000e+00> : vector<2xf32>
    %8 = vector.multi_reduction <add>, %7, %cst_2 [1] : vector<2x1024xf32> to vector<2xf32>
    %9 = vector.shape_cast %8 : vector<2xf32> to vector<2x1xf32>
    %cst_3 = arith.constant 9.77517105E-4 : f32
    %10 = vector.broadcast %cst_3 : f32 to vector<2x1xf32>
    %11 = arith.mulf %9, %10 : vector<2x1xf32>
    %12 = math.sqrt %11 : vector<2x1xf32>
    %cst_4 = arith.constant 9.99999974E-6 : f32
    %13 = vector.broadcast %cst_4 : f32 to vector<2x1xf32>
    %14 = arith.addf %12, %13 : vector<2x1xf32>
    %cst_5 = arith.constant 1.000000e+00 : f32
    %15 = vector.broadcast %cst_5 : f32 to vector<2x1xf32>
    %16 = arith.divf %15, %14 : vector<2x1xf32>
    %17 = vector.broadcast %16 : vector<2x1xf32> to vector<2x1024xf32>
    %18 = arith.mulf %6, %17 : vector<2x1024xf32>
    %c0_6 = arith.constant 0 : index
    %c0_7 = arith.constant 0 : index
    %19 = vector.load %arg2[%c0_6, %c0_7] : memref<1x1024xf32, #tpu.memory_space<vmem>>, vector<1x1024xf32>
    %20 = vector.broadcast %19 : vector<1x1024xf32> to vector<2x1024xf32>
    %21 = arith.mulf %18, %20 : vector<2x1024xf32>
    %c0_8 = arith.constant 0 : index
    %c0_9 = arith.constant 0 : index
    %22 = vector.load %arg3[%c0_8, %c0_9] : memref<1x1024xf32, #tpu.memory_space<vmem>>, vector<1x1024xf32>
    %23 = vector.broadcast %22 : vector<1x1024xf32> to vector<2x1024xf32>
    %24 = arith.addf %21, %23 : vector<2x1024xf32>
    %c0_10 = arith.constant 0 : index
    %c0_11 = arith.constant 0 : index
    %25 = vector.load %arg4[%c0_10, %c0_11] : memref<2x1024xf32, #tpu.memory_space<vmem>>, vector<2x1024xf32>
    tpu.vector_store %arg4[%c0_10, %c0_11], %24 {strides = array<i32>} : memref<2x1024xf32, #tpu.memory_space<vmem>>, vector<2x1024xf32>,
    return
  }
  func.func @transform_0(%arg0: i32) -> (i32, i32) {
    %c0_i32 = arith.constant 0 : i32
    %c0_i32_0 = arith.constant 0 : i32
    return %arg0, %c0_i32 : i32, i32
  }
  func.func @transform_1(%arg0: i32) -> (i32, i32) {
    %c0_i32 = arith.constant 0 : i32
    %c0_i32_0 = arith.constant 0 : i32
    %c0_i32_1 = arith.constant 0 : i32
    return %c0_i32, %c0_i32_0 : i32, i32
  }
  func.func @transform_2(%arg0: i32) -> (i32, i32) {
    %c0_i32 = arith.constant 0 : i32
    %c0_i32_0 = arith.constant 0 : i32
    %c0_i32_1 = arith.constant 0 : i32
    return %c0_i32, %c0_i32_0 : i32, i32
  }
  func.func @transform_3(%arg0: i32) -> (i32, i32) {
    %c0_i32 = arith.constant 0 : i32
    %c0_i32_0 = arith.constant 0 : i32
    return %arg0, %c0_i32 : i32, i32
  }
}

</mosaic_0001>

<bundles_post_ra>
// kernel: layer_norm.1
= control target key start
LH: loop header
LB: loop body
LE: loop exit
PB: predicated region body
PF: predicated region fallthrough
CT: control target
= control target key end

     0   :  { %v22_v0 = vlaneseq  ;;  %v333_v1 = vmov 1983009808   ;;  %vm60_vm0 = vcmask 1041408   ;;  %v334_v33 = vmov 269488144   ;;  %s433_s0 = inlined_call_operand.vmem [shape: f32[2,1024], index: 0, kind: input, shape index: {}]   ;;  %s434_s1 = inlined_call_operand.vmem [shape: f32[1,1024], index: 1, kind: input, shape index: {}]   ;;  %s435_s2 = inlined_call_operand.vmem [shape: f32[1,1024], index: 2, kind: input, shape index: {}]   ;;  %s436_s3 = inlined_call_operand.vmem [shape: f32[2,1024], index: 3, kind: output, shape index: {}]  }
   0x1   :  { %v20_v2 = vunpack.c.l.s4 %v333_v1  ;;  %v14_v3 = vld [vmem:[%s433_s0] sm:$0xff]  ;;  %v15_v8 = vld [vmem:[%s433_s0 + $0x8] sm:$0xff]  ;;  %v81_v34 = vunpack.c.l.s4 %v334_v33 }
   0x2   :  { %v358_v4 = vshrl.u32 %v22_v0, 7  ;;  %v18_v5 = vcombine.high %v14_v3, %v14_v3  ;;  %v35_v13 = vcombine.high %v15_v8, %v15_v8 }
   0x3   :  { %v21_v6 = vunpack.c.0.s8 %v20_v2  ;;  %v82_v35 = vunpack.c.0.s8 %v81_v34 }
   0x5   :  { %v361_v7 = vsub.s32 %v21_v6, %v358_v4  ;;  %v379_v36 = vsub.s32 %v82_v35, %v358_v4 }
   0x7   :  { %v25_v9 = vrot.slane %v14_v3, %v361_v7  ;;  %v32_v10 = vrot.slane %v18_v5, %v361_v7  ;;  %v42_v14 = vrot.slane %v15_v8, %v361_v7  ;;  %v49_v19 = vrot.slane %v35_v13, %v361_v7 }
   0x8   :  { %v183_v13 = vsub.s32 1, %v358_v4 }
   0x9   :  { %v33_v11 = vcombine.high %v25_v9, %v25_v9  ;;  %v34_v12 = vcombine.high %v32_v10, %v32_v10  ;;  %v61_v15 = vsel %vm60_vm0, %v25_v9, 0.0  ;;  %v64_v17 = vsel %vm60_vm0, %v32_v10, 0.0 }
   0xa   :  { %v50_v20 = vcombine.high %v42_v14, %v42_v14  ;;  %v68_v23 = vsel %vm60_vm0, %v42_v14, 0.0  ;;  %v51_v25 = vcombine.high %v49_v19, %v49_v19  ;;  %v72_v28 = vsel %vm60_vm0, %v49_v19, 0.0  ;;  %v175_v19 = vld [vmem:[%s434_s1] sm:$0xff] }
   0xb   :  { %v62_v16 = vsel %vm60_vm0, %v33_v11, 0.0  ;;  %v66_v21 = vsel %vm60_vm0, %v34_v12, 0.0  ;;  %v179_v12 = vsub.s32 0, %v358_v4 }
   0xc   :  { %v63_v18 = vadd.f32 %v62_v16, %v61_v15  ;;  %v70_v26 = vsel %vm60_vm0, %v50_v20, 0.0  ;;  %v74_v30 = vsel %vm60_vm0, %v51_v25, 0.0  ;;  %v187_v15 = vsub.s32 2, %v358_v4 }
   0xd   :  { %v191_v16 = vsub.s32 3, %v358_v4  ;;  %v199_v20 = vsub.s32 5, %v358_v4  ;;  %v180_v25 = vrot.slane %v175_v19, %v179_v12 }
   0xe   :  { %v65_v22 = vadd.f32 %v64_v17, %v63_v18  ;;  %v195_v17 = vsub.s32 4, %v358_v4 }
  0x10   :  { %v67_v24 = vadd.f32 %v66_v21, %v65_v22  ;;  %v203_v21 = vsub.s32 6, %v358_v4  ;;  %v207_v22 = vsub.s32 7, %v358_v4 }
  0x12   :  { %v69_v27 = vadd.f32 %v68_v23, %v67_v24  ;;  %v247_v24 = vld [vmem:[%s435_s2] sm:$0xff] }
  0x13   :  { %v252_v33 = vrot.slane %v247_v24, %v179_v12  ;;  %v256_v34 = vrot.slane %v247_v24, %v183_v13  ;;  %v260_v35 = vrot.slane %v247_v24, %v187_v15  ;;  %v272_v4 = vrot.slane %v247_v24, %v199_v20 }
  0x14   :  { %v71_v29 = vadd.f32 %v70_v26, %v69_v27  ;;  %v184_v26 = vrot.slane %v175_v19, %v183_v13  ;;  %v188_v27 = vrot.slane %v175_v19, %v187_v15 }
  0x16   :  { %v73_v31 = vadd.f32 %v72_v28, %v71_v29  ;;  %v192_v28 = vrot.slane %v175_v19, %v191_v16  ;;  %v196_v29 = vrot.slane %v175_v19, %v195_v17 }
  0x18   :  { %v75_v32 = vadd.f32 %v74_v30, %v73_v31  ;;  %v200_v30 = vrot.slane %v175_v19, %v199_v20  ;;  %v204_v31 = vrot.slane %v175_v19, %v203_v21 }
  0x1a   :  { %76 = vadd.xlane.f32.xlu0 %v75_v32  ;;  %v208_v32 = vrot.slane %v175_v19, %v207_v22 }
  0xa3   :  { %v77_v37 = vpop.xlane.xlu0 %76 }
  0xa4   :  { %v78_v38 = vmul.f32 0.0009765625, %v77_v37  ;;  %v264_v37 = vrot.slane %v247_v24, %v191_v16 }
  0xa6   :  { %v86_v39 = vrot.slane %v78_v38, %v379_v36  ;;  %v268_v38 = vrot.slane %v247_v24, %v195_v17 }
  0xa8   :  { %v382_v40 = vsub.f32 %v14_v3, %v86_v39  ;;  %v384_v41 = vsub.f32 %v15_v8, %v86_v39  ;;  %v276_v39 = vrot.slane %v247_v24, %v203_v21 }
  0xaa   :  { %v90_v42 = vmul.f32 %v382_v40, %v382_v40  ;;  %v91_v43 = vmul.f32 %v384_v41, %v384_v41 }
  0xac   :  { %v94_v44 = vcombine.high %v90_v42, %v90_v42  ;;  %v101_v45 = vrot.slane %v90_v42, %v361_v7  ;;  %v118_v48 = vrot.slane %v91_v43, %v361_v7  ;;  %v111_v52 = vcombine.high %v91_v43, %v91_v43 }
  0xad   :  { %v280_v42 = vrot.slane %v247_v24, %v207_v22  ;;  %v209_v43 = vcombine.low %v180_v25, %v184_v26 }
  0xae   :  { %v108_v46 = vrot.slane %v94_v44, %v361_v7  ;;  %v109_v47 = vcombine.high %v101_v45, %v101_v45  ;;  %v136_v49 = vsel %vm60_vm0, %v101_v45, 0.0  ;;  %v125_v56 = vrot.slane %v111_v52, %v361_v7 }
  0xaf   :  { %v126_v57 = vcombine.high %v118_v48, %v118_v48  ;;  %v143_v60 = vsel %vm60_vm0, %v118_v48, 0.0  ;;  %v210_v44 = vcombine.low %v188_v27, %v192_v28  ;;  %v226_v45 = vcombine.low %v196_v29, %v200_v30 }
  0xb0   :  { %v137_v50 = vsel %vm60_vm0, %v109_v47, 0.0  ;;  %v110_v51 = vcombine.high %v108_v46, %v108_v46  ;;  %v139_v54 = vsel %vm60_vm0, %v108_v46, 0.0  ;;  %v127_v62 = vcombine.high %v125_v56, %v125_v56 }
  0xb1   :  { %v138_v53 = vadd.f32 %v137_v50, %v136_v49  ;;  %v145_v63 = vsel %vm60_vm0, %v126_v57, 0.0  ;;  %v147_v1 = vsel %vm60_vm0, %v125_v56, 0.0  ;;  %v227_v46 = vcombine.low %v204_v31, %v208_v32 }
  0xb2   :  { %v141_v58 = vsel %vm60_vm0, %v110_v51, 0.0  ;;  %v149_v3 = vsel %vm60_vm0, %v127_v62, 0.0  ;;  %v281_v47 = vcombine.low %v252_v33, %v256_v34  ;;  %v282_v48 = vcombine.low %v260_v35, %v264_v37 }
  0xb3   :  { %v140_v55 = vadd.f32 %v139_v54, %v138_v53  ;;  %v298_v49 = vcombine.low %v268_v38, %v272_v4  ;;  %v299_v50 = vcombine.low %v276_v39, %v280_v42  ;;  %v217_v51 = vrot.slane %v209_v43, %v361_v7 }
  0xb4   :  { %v224_v52 = vrot.slane %v210_v44, %v361_v7  ;;  %v234_v53 = vrot.slane %v226_v45, %v361_v7  ;;  %v241_v54 = vrot.slane %v227_v46, %v361_v7  ;;  %v296_v56 = vrot.slane %v282_v48, %v361_v7 }
  0xb5   :  { %v142_v59 = vadd.f32 %v141_v58, %v140_v55  ;;  %v289_v55 = vrot.slane %v281_v47, %v361_v7  ;;  %v306_v57 = vrot.slane %v298_v49, %v361_v7  ;;  %v313_v58 = vrot.slane %v299_v50, %v361_v7 }
  0xb7   :  { %v144_v61 = vadd.f32 %v143_v60, %v142_v59  ;;  %v225_v60 = vcombine.low %v217_v51, %v224_v52 }
  0xb9   :  { %v146_v0 = vadd.f32 %v145_v63, %v144_v61  ;;  %v242_v61 = vcombine.low %v234_v53, %v241_v54  ;;  %v297_v63 = vcombine.low %v289_v55, %v296_v56 }
  0xbb   :  { %v148_v2 = vadd.f32 %v147_v1, %v146_v0  ;;  %v314_v0 = vcombine.low %v306_v57, %v313_v58 }
  0xbd   :  { %v150_v5 = vadd.f32 %v149_v3, %v148_v2 }
  0xbf   :  { %151 = vadd.xlane.f32.xlu0 %v150_v5 }
 0x148   :  { %v152_v6 = vpop.xlane.xlu0 %151 }
 0x149   :  { %v153_v8 = vmul.f32 0.0009775171, %v152_v6 }
 0x14b   :  { %329 = vrsqrt.f32 %v153_v8  ;;  %vm156_vm1 = vcmp.eq.f32.partialorder %v153_v8, inf  ;;  %v159_v11 = vand.u32 2147483648, %v153_v8  ;;  %vm158_vm2 = vcmp.eq.f32.partialorder %v153_v8, 0.0 }
 0x158   :  { %v330_v9 = vpop.eup %329 }
 0x159   :  { %v155_v10 = vmul.f32 %v330_v9, %v153_v8 }
 0x15b   :  { %v157_v14 = vsel %vm156_vm1, %v153_v8, %v155_v10 }
 0x15c   :  { %v160_v18 = vsel %vm158_vm2, %v159_v11, %v157_v14 }
 0x15d   :  { %v161_v23 = vadd.f32 1e-05, %v160_v18 }
 0x15f   :  { %331 = vrcp.f32 %v161_v23 }
 0x16c   :  { %v332_v59 = vpop.eup %331 }
 0x16d   :  { %v171_v62 = vrot.slane %v332_v59, %v379_v36 }
 0x16f   :  { %v173_v1 = vmul.f32 %v171_v62, %v382_v40  ;;  %v174_v2 = vmul.f32 %v171_v62, %v384_v41 }
 0x171   :  { %v245_v3 = vmul.f32 %v225_v60, %v173_v1  ;;  %v246_v5 = vmul.f32 %v242_v61, %v174_v2 }
 0x173   :  { %v317_v6 = vadd.f32 %v297_v63, %v245_v3  ;;  %v318_v8 = vadd.f32 %v314_v0, %v246_v5 }
 0x175   :  { %319 = vst [vmem:[%s436_s3] sm:$0xff] %v317_v6  ;;  %320 = vst [vmem:[%s436_s3 + $0x8] sm:$0xff] %v318_v8 }

</bundles_post_ra>
